<compile_context>
chip_gen: v6e
topology: v6e:2x2x1
jax: 0.10.0
libtpu: 0.0.40
codegen_flags: <defaults>
</compile_context>

<pallas_src>
import functools

import numpy as np
import jax
import jax.numpy as jnp
from jax import lax
from jax.experimental import pallas as pl
from jax.experimental.pallas import tpu as pltpu


def _round_up(x, m):
    return ((x + m - 1) // m) * m


# ------------------------------- Pallas kernel -------------------------------

def _mgkn_kernel(x_in_ref, fcin_w_ref, fcin_b_ref,
                 fco1_w_ref, fco1_b_ref, fco2_w_ref, fco2_b_ref,
                 ea_ref, src_ref, dst_ref, invdeg_ref,
                 w1_ref, b1_ref, w2_ref, b2_ref, w3_ref, b3_ref,
                 out_ref, x_vmem,
                 *, width, n_out_rows):
    """One grid point = one NNConv step of one depth iteration.

    grid = (depth, n_steps); x is carried in VMEM scratch across grid iterations.
    """
    f32 = jnp.float32
    d = pl.program_id(0)
    s = pl.program_id(1)

    # ---- first grid point: lift node features with fc_in, park x in VMEM ----
    @pl.when(jnp.logical_and(d == 0, s == 0))
    def _():
        x0 = jnp.dot(x_in_ref[...], fcin_w_ref[...],
                     preferred_element_type=f32) + fcin_b_ref[...]
        x_vmem[...] = x0

    # ---- per-step edge-kernel MLP (fused; h never touches HBM) ----
    ea = ea_ref[0]                                               # (E, ker_in) f32
    z = jnp.maximum(jnp.dot(ea, w1_ref[0], preferred_element_type=f32) + b1_ref[0], 0.0)
    z = jnp.maximum(jnp.dot(z, w2_ref[0], preferred_element_type=f32) + b2_ref[0], 0.0)
    h = jnp.dot(z, w3_ref[0], preferred_element_type=f32) + b3_ref[0]   # (E, w*w)

    x = x_vmem[...]                                              # (N_pad, width) f32
    n_pad = x.shape[0]
    e_pad = ea.shape[0]

    # ---- gather source node features via in-kernel selection built from indices ----
    src_col = src_ref[0]                                         # (E, 1) int32
    gsel = lax.broadcasted_iota(jnp.int32, (e_pad, n_pad), 1) == src_col
    gmat = jnp.where(gsel, 1.0, 0.0)                             # (E, N_pad) f32 0/1
    x_src = jnp.dot(gmat, x, preferred_element_type=f32)         # (E, width)

    # ---- per-edge message: msg[e,o] = sum_i x_src[e,i] * h[e, i*w+o]  (f32, VPU) ----
    msg = x_src[:, 0:1] * h[:, 0:width]
    for i in range(1, width):
        msg = msg + x_src[:, i:i + 1] * h[:, i * width:(i + 1) * width]

    # ---- scatter-mean to targets (pad edges have dst == -1 -> contribute nothing) ----
    dst_row = dst_ref[0]                                         # (1, E) int32
    ssel = lax.broadcasted_iota(jnp.int32, (n_pad, e_pad), 0) == dst_row
    smat = jnp.where(ssel, 1.0, 0.0)                             # (N_pad, E) f32 0/1
    agg = jnp.dot(smat, msg, preferred_element_type=f32)         # (N_pad, width)

    # residual + mean normalization (pre-broadcast on host) + ReLU
    x_new = jnp.maximum(x + agg * invdeg_ref[0], 0.0)
    x_vmem[...] = x_new

    # ---- last grid point: output head on the finest-level nodes ----
    @pl.when(jnp.logical_and(d == pl.num_programs(0) - 1,
                             s == pl.num_programs(1) - 1))
    def _():
        y = jnp.dot(x_new[:n_out_rows, :], fco1_w_ref[...],
                    preferred_element_type=f32) + fco1_b_ref[...]
        y = jnp.maximum(y, 0.0)
        y = jnp.dot(y, fco2_w_ref[...], preferred_element_type=f32) + fco2_b_ref[...]
        out_ref[...] = y


# --------------------------- parameter construction ---------------------------

def init_linear_params(key, fan_in, fan_out):
    kw, kb = jax.random.split(key)
    w = jax.random.normal(kw, (fan_in, fan_out), jnp.float32) / np.sqrt(fan_in)
    b = 0.01 * jax.random.normal(kb, (fan_out,), jnp.float32)
    return w, b


def init_densenet_params(key, layers):
    keys = jax.random.split(key, len(layers) - 1)
    return [init_linear_params(keys[i], layers[i], layers[i + 1])
            for i in range(len(layers) - 1)]


def _build_seq(level):
    """Per-depth execution order of conv layers, matching the PyTorch forward."""
    seq = []
    for l in range(level - 1):
        seq.append(('down', l))
    for l in reversed(range(level)):
        seq.append(('mid', l))
        if l > 0:
            seq.append(('up', l - 1))
    return seq


def _pad_edge_mlp(params, hidden):
    """Pad a 2- or 3-layer DenseNet to a uniform 3-layer [ker_in->H->H->out] form.

    Equivalence: zero-padded hidden channels stay zero through ReLU; the 2-layer case gets
    an identity middle layer (ReLU is idempotent on already-ReLU'd activations).
    """
    p = [(np.asarray(w, np.float32), np.asarray(b, np.float32)) for (w, b) in params]
    ker_in = p[0][0].shape[0]
    out_dim = p[-1][0].shape[1]
    wa, ba = p[0]
    kwl = wa.shape[1]

    w1 = np.zeros((ker_in, hidden), np.float32); w1[:, :kwl] = wa
    b1 = np.zeros((hidden,), np.float32); b1[:kwl] = ba
    if len(p) == 2:
        w2 = np.eye(hidden, dtype=np.float32)
        b2 = np.zeros((hidden,), np.float32)
        wb, bb = p[1]
        w3 = np.zeros((hidden, out_dim), np.float32); w3[:kwl, :] = wb
        b3 = bb
    else:
        wb, bb = p[1]
        w2 = np.zeros((hidden, hidden), np.float32); w2[:kwl, :kwl] = wb
        b2 = np.zeros((hidden,), np.float32); b2[:kwl] = bb
        wc, bc = p[2]
        w3 = np.zeros((hidden, out_dim), np.float32); w3[:kwl, :] = wc
        b3 = bc
    return (w1, b1.reshape(1, -1), w2, b2.reshape(1, -1), w3, b3.reshape(1, -1))


class KernelInducedPallas:
    def __init__(self, key, width, ker_width, depth, ker_in, points, level,
                 in_width=1, out_width=1):
        assert depth >= 1
        self.depth = depth
        self.width = width
        self.ker_width = ker_width
        self.ker_in = ker_in
        self.level = level
        self.points = points
        self.points_total = int(np.sum(points))
        self.in_width = in_width

        self.n_pad = _round_up(self.points_total, 8)
        self.p0_pad = _round_up(int(points[0]), 8)

        keys = jax.random.split(key, 6)
        self.fc_in = init_linear_params(keys[0], in_width, width)

        self.conv_down = []
        kd = jax.random.split(keys[1], max(level - 1, 1))
        for l in range(1, level):
            kw_l = ker_width // 2 ** l
            self.conv_down.append(init_densenet_params(kd[l - 1], [ker_in, kw_l, width ** 2]))

        self.conv_mid = []
        km = jax.random.split(keys[2], level)
        for l in range(level):
            kw_l = ker_width // 2 ** l
            self.conv_mid.append(init_densenet_params(km[l], [ker_in, kw_l, kw_l, width ** 2]))

        self.conv_up = []
        ku = jax.random.split(keys[3], max(level - 1, 1))
        for l in range(1, level):
            kw_l = ker_width // 2 ** l
            self.conv_up.append(init_densenet_params(ku[l - 1], [ker_in, kw_l, width ** 2]))

        self.fc_out1 = init_linear_params(keys[4], width, ker_width)
        self.fc_out2 = init_linear_params(keys[5], ker_width, 1)

        # Per-depth execution order and uniform (padded) per-step edge-MLP weight stacks
        # (depth-invariant -> built once here, streamed per step by BlockSpec index_maps).
        self.seq = _build_seq(level)
        self.n_steps = len(self.seq)
        kwls = []
        for kind, l in self.seq:
            kwls.append(ker_width // 2 ** (l if kind == 'mid' else l + 1))
        self.mlp_hidden = _round_up(max(kwls), 8)

        w1s, b1s, w2s, b2s, w3s, b3s = [], [], [], [], [], []
        for kind, l in self.seq:
            if kind == 'down':
                params = self.conv_down[l]
            elif kind == 'mid':
                params = self.conv_mid[l]
            else:
                params = self.conv_up[l]
            w1, b1, w2, b2, w3, b3 = _pad_edge_mlp(params, self.mlp_hidden)
            w1s.append(w1); b1s.append(b1); w2s.append(w2)
            b2s.append(b2); w3s.append(w3); b3s.append(b3)
        self.w1_s = jnp.asarray(np.stack(w1s))   # (S, ker_in, H)
        self.b1_s = jnp.asarray(np.stack(b1s))   # (S, 1, H)
        self.w2_s = jnp.asarray(np.stack(w2s))   # (S, H, H)
        self.b2_s = jnp.asarray(np.stack(b2s))   # (S, 1, H)
        self.w3_s = jnp.asarray(np.stack(w3s))   # (S, H, w*w)
        self.b3_s = jnp.asarray(np.stack(b3s))   # (S, 1, w*w)

    # ---- per-forward edge packing: pad to common E (multiple of 8), precompute 1/deg ----
    def _pack_edges(self, data):
        n_pad, width, ker_in = self.n_pad, self.width, self.ker_in
        raw = []
        for kind, l in self.seq:
            if kind == 'down':
                ei, ea, rng = data['edge_index_down'], data['edge_attr_down'], data['range_down'][l]
            elif kind == 'mid':
                ei, ea, rng = data['edge_index_mid'], data['edge_attr_mid'], data['range_mid'][l]
            else:
                ei, ea, rng = data['edge_index_up'], data['edge_attr_up'], data['range_up'][l]
            lo, hi = int(rng[0]), int(rng[1])
            raw.append((np.asarray(ei[0, lo:hi], np.int32),
                        np.asarray(ei[1, lo:hi], np.int32),
                        np.asarray(ea[lo:hi], np.float32)))
        e_max = _round_up(max(r[0].shape[0] for r in raw), 8)

        ea_s = np.zeros((self.n_steps, e_max, ker_in), np.float32)
        src_s = np.zeros((self.n_steps, e_max, 1), np.int32)
        dst_s = np.full((self.n_steps, 1, e_max), -1, np.int32)   # pad edges scatter nowhere
        inv_s = np.zeros((self.n_steps, n_pad, width), np.float32)
        for i, (src, dst, ea) in enumerate(raw):
            e = src.shape[0]
            ea_s[i, :e] = ea
            src_s[i, :e, 0] = src
            dst_s[i, 0, :e] = dst
            deg = np.zeros((n_pad,), np.float32)
            np.add.at(deg, dst, 1.0)
            inv = 1.0 / np.maximum(deg, 1.0)                      # scatter_mean: empty -> 0
            inv_s[i] = np.broadcast_to(inv[:, None], (n_pad, width))
        return (jnp.asarray(ea_s), jnp.asarray(src_s), jnp.asarray(dst_s),
                jnp.asarray(inv_s), e_max)

    def forward(self, data):
        ea_s, src_s, dst_s, inv_s, e_max = self._pack_edges(data)

        n_pad, width, ker_width = self.n_pad, self.width, self.ker_width
        ker_in, H, p0_pad = self.ker_in, self.mlp_hidden, self.p0_pad

        x = jnp.asarray(data['x'], jnp.float32)
        x_in = jnp.pad(x, ((0, n_pad - x.shape[0]), (0, 0)))

        inputs = [
            x_in,
            self.fc_in[0], self.fc_in[1].reshape(1, -1),
            self.fc_out1[0], self.fc_out1[1].reshape(1, -1),
            self.fc_out2[0], self.fc_out2[1].reshape(1, -1),
            ea_s, src_s, dst_s, inv_s,
            self.w1_s, self.b1_s, self.w2_s, self.b2_s, self.w3_s, self.b3_s,
        ]

        def full2(shape):
            return pl.BlockSpec(shape, lambda d, s: (0, 0))

        def step3(shape):
            return pl.BlockSpec((1,) + tuple(shape), lambda d, s: (s, 0, 0))

        in_specs = [
            full2((n_pad, self.in_width)),
            full2((self.in_width, width)), full2((1, width)),
            full2((width, ker_width)), full2((1, ker_width)),
            full2((ker_width, 1)), full2((1, 1)),
            step3((e_max, ker_in)),
            step3((e_max, 1)),
            step3((1, e_max)),
            step3((n_pad, width)),
            step3((ker_in, H)), step3((1, H)),
            step3((H, H)), step3((1, H)),
            step3((H, width * width)), step3((1, width * width)),
        ]

        kernel = functools.partial(_mgkn_kernel, width=width, n_out_rows=p0_pad)
        grid_spec = pltpu.PrefetchScalarGridSpec(
            num_scalar_prefetch=0,
            grid=(self.depth, self.n_steps),
            in_specs=in_specs,
            out_specs=pl.BlockSpec((p0_pad, 1), lambda d, s: (0, 0)),
            scratch_shapes=[pltpu.VMEM((n_pad, width), jnp.float32)],
        )
        out = pl.pallas_call(
            kernel,
            out_shape=jax.ShapeDtypeStruct((p0_pad, 1), jnp.float32),
            grid_spec=grid_spec,
            compiler_params=pltpu.CompilerParams(
                # Both axes carry the node-feature state -> sequential ("arbitrary").
                dimension_semantics=("arbitrary", "arbitrary"),
                # 48 MiB: safely below v7x's 64 MiB physical VMEM, a real raise vs the
                # 16/32 MiB scoped defaults on v5e/v6e.  Actual footprint here is tiny.
                vmem_limit_bytes=48 * 1024 * 1024),
        )(*inputs)
        return out[:int(self.points[0])]


# ------------------------------------ main ------------------------------------

def _make_level_edges(key, counts, src_ranges, dst_ranges, ker_in):
    """Concatenated [2, E_total] edge index, [E_total, ker_in] attrs, and (lo, hi) ranges."""
    keys = jax.random.split(key, len(counts) + 1)
    srcs, dsts, ranges = [], [], []
    off = 0
    for i, cnt in enumerate(counts):
        ks, kd = jax.random.split(keys[i])
        slo, shi = src_ranges[i]
        dlo, dhi = dst_ranges[i]
        srcs.append(jax.random.randint(ks, (cnt,), slo, shi, dtype=jnp.int32))
        dsts.append(jax.random.randint(kd, (cnt,), dlo, dhi, dtype=jnp.int32))
        ranges.append((off, off + cnt))
        off += cnt
    edge_index = jnp.stack([jnp.concatenate(srcs), jnp.concatenate(dsts)], axis=0)
    edge_attr = jax.random.normal(keys[-1], (off, ker_in), jnp.float32)
    return edge_index, edge_attr, ranges


if __name__ == "__main__":
    width, ker_width, depth, ker_in, level = 8, 16, 2, 6, 3
    in_width = 4
    points = [16, 8, 4]
    n_total = int(np.sum(points))
    offs = np.cumsum([0] + points)      # level node ranges: [0,16), [16,24), [24,28)

    root = jax.random.PRNGKey(0)
    k_model, k_x, k_down, k_mid, k_up = jax.random.split(root, 5)

    model = KernelInducedPallas(k_model, width, ker_width, depth, ker_in, points, level,
                                in_width=in_width, out_width=1)

    lvl = [(int(offs[l]), int(offs[l + 1])) for l in range(level)]

    # down: level l -> l+1 ; mid: within level l ; up: level l+1 -> l
    ei_down, ea_down, r_down = _make_level_edges(
        k_down, counts=[12, 8], src_ranges=[lvl[0], lvl[1]], dst_ranges=[lvl[1], lvl[2]],
        ker_in=ker_in)
    ei_mid, ea_mid, r_mid = _make_level_edges(
        k_mid, counts=[24, 16, 8], src_ranges=[lvl[0], lvl[1], lvl[2]],
        dst_ranges=[lvl[0], lvl[1], lvl[2]], ker_in=ker_in)
    ei_up, ea_up, r_up = _make_level_edges(
        k_up, counts=[12, 8], src_ranges=[lvl[1], lvl[2]], dst_ranges=[lvl[0], lvl[1]],
        ker_in=ker_in)

    data = {
        'x': jax.random.normal(k_x, (n_total, in_width), jnp.float32),
        'edge_index_down': ei_down, 'edge_attr_down': ea_down, 'range_down': r_down,
        'edge_index_mid': ei_mid, 'edge_attr_mid': ea_mid, 'range_mid': r_mid,
        'edge_index_up': ei_up, 'edge_attr_up': ea_up, 'range_up': r_up,
    }

    out = model.forward(data)
    out = jax.block_until_ready(out)
    assert out.shape == (points[0], 1), out.shape
    assert bool(jnp.all(jnp.isfinite(out)))
    print("KERNEL_OK")
</pallas_src>

<mosaic_0001>
module attributes {stable_mosaic.version = 11 : i64} {
  func.func @_mgkn_kernel(%arg0: i32, %arg1: i32, %arg2: memref<32x4xf32, #tpu.memory_space<vmem>>, %arg3: memref<4x8xf32, #tpu.memory_space<vmem>>, %arg4: memref<1x8xf32, #tpu.memory_space<vmem>>, %arg5: memref<8x16xf32, #tpu.memory_space<vmem>>, %arg6: memref<1x16xf32, #tpu.memory_space<vmem>>, %arg7: memref<16x1xf32, #tpu.memory_space<vmem>>, %arg8: memref<1x1xf32, #tpu.memory_space<vmem>>, %arg9: memref<1x24x6xf32, #tpu.memory_space<vmem>>, %arg10: memref<1x24x1xi32, #tpu.memory_space<vmem>>, %arg11: memref<1x1x24xi32, #tpu.memory_space<vmem>>, %arg12: memref<1x32x8xf32, #tpu.memory_space<vmem>>, %arg13: memref<1x6x16xf32, #tpu.memory_space<vmem>>, %arg14: memref<1x1x16xf32, #tpu.memory_space<vmem>>, %arg15: memref<1x16x16xf32, #tpu.memory_space<vmem>>, %arg16: memref<1x1x16xf32, #tpu.memory_space<vmem>>, %arg17: memref<1x16x64xf32, #tpu.memory_space<vmem>>, %arg18: memref<1x1x64xf32, #tpu.memory_space<vmem>>, %arg19: memref<16x1xf32, #tpu.memory_space<vmem>>, %arg20: memref<32x8xf32, #tpu.memory_space<vmem>>) attributes {dimension_semantics = [#tpu.dimension_semantics<arbitrary>, #tpu.dimension_semantics<arbitrary>], iteration_bounds = array<i64: 2, 7>, scalar_prefetch = 0 : i64, scratch_operands = 1 : i64, tpu.core_type = #tpu.core_type<tc>, window_params = [{pipeline_mode = #tpu.pipeline_mode<synchronous>, transform_indices = @transform_0, window_bounds = array<i64: 32, 4>}, {pipeline_mode = #tpu.pipeline_mode<synchronous>, transform_indices = @transform_1, window_bounds = array<i64: 4, 8>}, {pipeline_mode = #tpu.pipeline_mode<synchronous>, transform_indices = @transform_2, window_bounds = array<i64: 1, 8>}, {pipeline_mode = #tpu.pipeline_mode<synchronous>, transform_indices = @transform_3, window_bounds = array<i64: 8, 16>}, {pipeline_mode = #tpu.pipeline_mode<synchronous>, transform_indices = @transform_4, window_bounds = array<i64: 1, 16>}, {pipeline_mode = #tpu.pipeline_mode<synchronous>, transform_indices = @transform_5, window_bounds = array<i64: 16, 1>}, {pipeline_mode = #tpu.pipeline_mode<synchronous>, transform_indices = @transform_6, window_bounds = array<i64: 1, 1>}, {transform_indices = @transform_7, window_bounds = array<i64: 1, 24, 6>}, {transform_indices = @transform_8, window_bounds = array<i64: 1, 24, 1>}, {transform_indices = @transform_9, window_bounds = array<i64: 1, 1, 24>}, {transform_indices = @transform_10, window_bounds = array<i64: 1, 32, 8>}, {transform_indices = @transform_11, window_bounds = array<i64: 1, 6, 16>}, {transform_indices = @transform_12, window_bounds = array<i64: 1, 1, 16>}, {transform_indices = @transform_13, window_bounds = array<i64: 1, 16, 16>}, {transform_indices = @transform_14, window_bounds = array<i64: 1, 1, 16>}, {transform_indices = @transform_15, window_bounds = array<i64: 1, 16, 64>}, {transform_indices = @transform_16, window_bounds = array<i64: 1, 1, 64>}, {pipeline_mode = #tpu.pipeline_mode<synchronous>, transform_indices = @transform_17, window_bounds = array<i64: 16, 1>}]} {
    %c0_i32 = arith.constant 0 : i32
    %0 = arith.cmpi eq, %arg0, %c0_i32 : i32
    %c0_i32_0 = arith.constant 0 : i32
    %1 = arith.cmpi eq, %arg1, %c0_i32_0 : i32
    %2 = arith.andi %0, %1 : i1
    %3 = arith.extui %2 : i1 to i32
    %c0_i32_1 = arith.constant 0 : i32
    %4 = arith.cmpi ne, %3, %c0_i32_1 : i32
    scf.if %4 {
      %c0_47 = arith.constant 0 : index
      %c0_48 = arith.constant 0 : index
      %102 = vector.load %arg2[%c0_47, %c0_48] : memref<32x4xf32, #tpu.memory_space<vmem>>, vector<32x4xf32>
      %c0_49 = arith.constant 0 : index
      %c0_50 = arith.constant 0 : index
      %103 = vector.load %arg3[%c0_49, %c0_50] : memref<4x8xf32, #tpu.memory_space<vmem>>, vector<4x8xf32>
      %cst_51 = arith.constant dense<0.000000e+00> : vector<32x8xf32>
      %104 = tpu.matmul %102, %103, %cst_51 {dimension_numbers = #tpu.dot_dimension_numbers<[1], [0], [0], [1], [0, 0, 1, 1], [], []>} : vector<32x4xf32>, vector<4x8xf32>, vector<32x8xf32> -> vector<32x8xf32>
      %c0_52 = arith.constant 0 : index
      %c0_53 = arith.constant 0 : index
      %105 = vector.load %arg4[%c0_52, %c0_53] : memref<1x8xf32, #tpu.memory_space<vmem>>, vector<1x8xf32>
      %106 = vector.broadcast %105 : vector<1x8xf32> to vector<32x8xf32>
      %107 = arith.addf %104, %106 : vector<32x8xf32>
      %c0_54 = arith.constant 0 : index
      %c0_55 = arith.constant 0 : index
      %108 = vector.load %arg20[%c0_54, %c0_55] : memref<32x8xf32, #tpu.memory_space<vmem>>, vector<32x8xf32>
      tpu.vector_store %arg20[%c0_54, %c0_55], %107 {strides = array<i32>} : memref<32x8xf32, #tpu.memory_space<vmem>>, vector<32x8xf32>,
    } else {
    }
    %c0 = arith.constant 0 : index
    %c0_2 = arith.constant 0 : index
    %c0_3 = arith.constant 0 : index
    %5 = vector.load %arg9[%c0, %c0_2, %c0_3] : memref<1x24x6xf32, #tpu.memory_space<vmem>>, vector<1x24x6xf32>
    %6 = vector.shape_cast %5 : vector<1x24x6xf32> to vector<24x6xf32>
    %c0_4 = arith.constant 0 : index
    %c0_5 = arith.constant 0 : index
    %c0_6 = arith.constant 0 : index
    %7 = vector.load %arg13[%c0_4, %c0_5, %c0_6] : memref<1x6x16xf32, #tpu.memory_space<vmem>>, vector<1x6x16xf32>
    %8 = vector.shape_cast %7 : vector<1x6x16xf32> to vector<6x16xf32>
    %cst = arith.constant dense<0.000000e+00> : vector<24x16xf32>
    %9 = tpu.matmul %6, %8, %cst {dimension_numbers = #tpu.dot_dimension_numbers<[1], [0], [0], [1], [0, 0, 1, 1], [], []>} : vector<24x6xf32>, vector<6x16xf32>, vector<24x16xf32> -> vector<24x16xf32>
    %c0_7 = arith.constant 0 : index
    %c0_8 = arith.constant 0 : index
    %c0_9 = arith.constant 0 : index
    %10 = vector.load %arg14[%c0_7, %c0_8, %c0_9] : memref<1x1x16xf32, #tpu.memory_space<vmem>>, vector<1x1x16xf32>
    %11 = vector.shape_cast %10 : vector<1x1x16xf32> to vector<1x16xf32>
    %12 = vector.broadcast %11 : vector<1x16xf32> to vector<24x16xf32>
    %13 = arith.addf %9, %12 : vector<24x16xf32>
    %cst_10 = arith.constant 0.000000e+00 : f32
    %14 = vector.broadcast %cst_10 : f32 to vector<24x16xf32>
    %15 = arith.maximumf %13, %14 : vector<24x16xf32>
    %c0_11 = arith.constant 0 : index
    %c0_12 = arith.constant 0 : index
    %c0_13 = arith.constant 0 : index
    %16 = vector.load %arg15[%c0_11, %c0_12, %c0_13] : memref<1x16x16xf32, #tpu.memory_space<vmem>>, vector<1x16x16xf32>
    %17 = vector.shape_cast %16 : vector<1x16x16xf32> to vector<16x16xf32>
    %cst_14 = arith.constant dense<0.000000e+00> : vector<24x16xf32>
    %18 = tpu.matmul %15, %17, %cst_14 {dimension_numbers = #tpu.dot_dimension_numbers<[1], [0], [0], [1], [0, 0, 1, 1], [], []>} : vector<24x16xf32>, vector<16x16xf32>, vector<24x16xf32> -> vector<24x16xf32>
    %c0_15 = arith.constant 0 : index
    %c0_16 = arith.constant 0 : index
    %c0_17 = arith.constant 0 : index
    %19 = vector.load %arg16[%c0_15, %c0_16, %c0_17] : memref<1x1x16xf32, #tpu.memory_space<vmem>>, vector<1x1x16xf32>
    %20 = vector.shape_cast %19 : vector<1x1x16xf32> to vector<1x16xf32>
    %21 = vector.broadcast %20 : vector<1x16xf32> to vector<24x16xf32>
    %22 = arith.addf %18, %21 : vector<24x16xf32>
    %cst_18 = arith.constant 0.000000e+00 : f32
    %23 = vector.broadcast %cst_18 : f32 to vector<24x16xf32>
    %24 = arith.maximumf %22, %23 : vector<24x16xf32>
    %c0_19 = arith.constant 0 : index
    %c0_20 = arith.constant 0 : index
    %c0_21 = arith.constant 0 : index
    %25 = vector.load %arg17[%c0_19, %c0_20, %c0_21] : memref<1x16x64xf32, #tpu.memory_space<vmem>>, vector<1x16x64xf32>
    %26 = vector.shape_cast %25 : vector<1x16x64xf32> to vector<16x64xf32>
    %cst_22 = arith.constant dense<0.000000e+00> : vector<24x64xf32>
    %27 = tpu.matmul %24, %26, %cst_22 {dimension_numbers = #tpu.dot_dimension_numbers<[1], [0], [0], [1], [0, 0, 1, 1], [], []>} : vector<24x16xf32>, vector<16x64xf32>, vector<24x64xf32> -> vector<24x64xf32>
    %c0_23 = arith.constant 0 : index
    %c0_24 = arith.constant 0 : index
    %c0_25 = arith.constant 0 : index
    %28 = vector.load %arg18[%c0_23, %c0_24, %c0_25] : memref<1x1x64xf32, #tpu.memory_space<vmem>>, vector<1x1x64xf32>
    %29 = vector.shape_cast %28 : vector<1x1x64xf32> to vector<1x64xf32>
    %30 = vector.broadcast %29 : vector<1x64xf32> to vector<24x64xf32>
    %31 = arith.addf %27, %30 : vector<24x64xf32>
    %c0_26 = arith.constant 0 : index
    %c0_27 = arith.constant 0 : index
    %32 = vector.load %arg20[%c0_26, %c0_27] : memref<32x8xf32, #tpu.memory_space<vmem>>, vector<32x8xf32>
    %c0_28 = arith.constant 0 : index
    %c0_29 = arith.constant 0 : index
    %c0_30 = arith.constant 0 : index
    %33 = vector.load %arg10[%c0_28, %c0_29, %c0_30] : memref<1x24x1xi32, #tpu.memory_space<vmem>>, vector<1x24x1xi32>
    %34 = vector.shape_cast %33 : vector<1x24x1xi32> to vector<24x1xi32>
    %35 = tpu.iota {dimensions = array<i32: 1>} : vector<24x32xi32>
    %36 = vector.broadcast %34 : vector<24x1xi32> to vector<24x32xi32>
    %37 = arith.cmpi eq, %35, %36 : vector<24x32xi32>
    %cst_31 = arith.constant 1.000000e+00 : f32
    %cst_32 = arith.constant 0.000000e+00 : f32
    %38 = vector.broadcast %cst_31 : f32 to vector<24x32xf32>
    %39 = vector.broadcast %cst_32 : f32 to vector<24x32xf32>
    %40 = arith.select %37, %38, %39 : vector<24x32xi1>, vector<24x32xf32>
    %cst_33 = arith.constant dense<0.000000e+00> : vector<24x8xf32>
    %41 = tpu.matmul %40, %32, %cst_33 {dimension_numbers = #tpu.dot_dimension_numbers<[1], [0], [0], [1], [0, 0, 1, 1], [], []>} : vector<24x32xf32>, vector<32x8xf32>, vector<24x8xf32> -> vector<24x8xf32>
    %42 = vector.extract_strided_slice %41 {offsets = [0, 0], sizes = [24, 1], strides = [1, 1]} : vector<24x8xf32> to vector<24x1xf32>
    %43 = vector.extract_strided_slice %31 {offsets = [0, 0], sizes = [24, 8], strides = [1, 1]} : vector<24x64xf32> to vector<24x8xf32>
    %44 = vector.broadcast %42 : vector<24x1xf32> to vector<24x8xf32>
    %45 = arith.mulf %44, %43 : vector<24x8xf32>
    %46 = vector.extract_strided_slice %41 {offsets = [0, 1], sizes = [24, 1], strides = [1, 1]} : vector<24x8xf32> to vector<24x1xf32>
    %47 = vector.extract_strided_slice %31 {offsets = [0, 8], sizes = [24, 8], strides = [1, 1]} : vector<24x64xf32> to vector<24x8xf32>
    %48 = vector.broadcast %46 : vector<24x1xf32> to vector<24x8xf32>
    %49 = arith.mulf %48, %47 : vector<24x8xf32>
    %50 = arith.addf %45, %49 : vector<24x8xf32>
    %51 = vector.extract_strided_slice %41 {offsets = [0, 2], sizes = [24, 1], strides = [1, 1]} : vector<24x8xf32> to vector<24x1xf32>
    %52 = vector.extract_strided_slice %31 {offsets = [0, 16], sizes = [24, 8], strides = [1, 1]} : vector<24x64xf32> to vector<24x8xf32>
    %53 = vector.broadcast %51 : vector<24x1xf32> to vector<24x8xf32>
    %54 = arith.mulf %53, %52 : vector<24x8xf32>
    %55 = arith.addf %50, %54 : vector<24x8xf32>
    %56 = vector.extract_strided_slice %41 {offsets = [0, 3], sizes = [24, 1], strides = [1, 1]} : vector<24x8xf32> to vector<24x1xf32>
    %57 = vector.extract_strided_slice %31 {offsets = [0, 24], sizes = [24, 8], strides = [1, 1]} : vector<24x64xf32> to vector<24x8xf32>
    %58 = vector.broadcast %56 : vector<24x1xf32> to vector<24x8xf32>
    %59 = arith.mulf %58, %57 : vector<24x8xf32>
    %60 = arith.addf %55, %59 : vector<24x8xf32>
    %61 = vector.extract_strided_slice %41 {offsets = [0, 4], sizes = [24, 1], strides = [1, 1]} : vector<24x8xf32> to vector<24x1xf32>
    %62 = vector.extract_strided_slice %31 {offsets = [0, 32], sizes = [24, 8], strides = [1, 1]} : vector<24x64xf32> to vector<24x8xf32>
    %63 = vector.broadcast %61 : vector<24x1xf32> to vector<24x8xf32>
    %64 = arith.mulf %63, %62 : vector<24x8xf32>
    %65 = arith.addf %60, %64 : vector<24x8xf32>
    %66 = vector.extract_strided_slice %41 {offsets = [0, 5], sizes = [24, 1], strides = [1, 1]} : vector<24x8xf32> to vector<24x1xf32>
    %67 = vector.extract_strided_slice %31 {offsets = [0, 40], sizes = [24, 8], strides = [1, 1]} : vector<24x64xf32> to vector<24x8xf32>
    %68 = vector.broadcast %66 : vector<24x1xf32> to vector<24x8xf32>
    %69 = arith.mulf %68, %67 : vector<24x8xf32>
    %70 = arith.addf %65, %69 : vector<24x8xf32>
    %71 = vector.extract_strided_slice %41 {offsets = [0, 6], sizes = [24, 1], strides = [1, 1]} : vector<24x8xf32> to vector<24x1xf32>
    %72 = vector.extract_strided_slice %31 {offsets = [0, 48], sizes = [24, 8], strides = [1, 1]} : vector<24x64xf32> to vector<24x8xf32>
    %73 = vector.broadcast %71 : vector<24x1xf32> to vector<24x8xf32>
    %74 = arith.mulf %73, %72 : vector<24x8xf32>
    %75 = arith.addf %70, %74 : vector<24x8xf32>
    %76 = vector.extract_strided_slice %41 {offsets = [0, 7], sizes = [24, 1], strides = [1, 1]} : vector<24x8xf32> to vector<24x1xf32>
    %77 = vector.extract_strided_slice %31 {offsets = [0, 56], sizes = [24, 8], strides = [1, 1]} : vector<24x64xf32> to vector<24x8xf32>
    %78 = vector.broadcast %76 : vector<24x1xf32> to vector<24x8xf32>
    %79 = arith.mulf %78, %77 : vector<24x8xf32>
    %80 = arith.addf %75, %79 : vector<24x8xf32>
    %c0_34 = arith.constant 0 : index
    %c0_35 = arith.constant 0 : index
    %c0_36 = arith.constant 0 : index
    %81 = vector.load %arg11[%c0_34, %c0_35, %c0_36] : memref<1x1x24xi32, #tpu.memory_space<vmem>>, vector<1x1x24xi32>
    %82 = vector.shape_cast %81 : vector<1x1x24xi32> to vector<1x24xi32>
    %83 = tpu.iota {dimensions = array<i32: 0>} : vector<32x24xi32>
    %84 = vector.broadcast %82 : vector<1x24xi32> to vector<32x24xi32>
    %85 = arith.cmpi eq, %83, %84 : vector<32x24xi32>
    %cst_37 = arith.constant 1.000000e+00 : f32
    %cst_38 = arith.constant 0.000000e+00 : f32
    %86 = vector.broadcast %cst_37 : f32 to vector<32x24xf32>
    %87 = vector.broadcast %cst_38 : f32 to vector<32x24xf32>
    %88 = arith.select %85, %86, %87 : vector<32x24xi1>, vector<32x24xf32>
    %cst_39 = arith.constant dense<0.000000e+00> : vector<32x8xf32>
    %89 = tpu.matmul %88, %80, %cst_39 {dimension_numbers = #tpu.dot_dimension_numbers<[1], [0], [0], [1], [0, 0, 1, 1], [], []>} : vector<32x24xf32>, vector<24x8xf32>, vector<32x8xf32> -> vector<32x8xf32>
    %c0_40 = arith.constant 0 : index
    %c0_41 = arith.constant 0 : index
    %c0_42 = arith.constant 0 : index
    %90 = vector.load %arg12[%c0_40, %c0_41, %c0_42] : memref<1x32x8xf32, #tpu.memory_space<vmem>>, vector<1x32x8xf32>
    %91 = vector.shape_cast %90 : vector<1x32x8xf32> to vector<32x8xf32>
    %92 = arith.mulf %89, %91 : vector<32x8xf32>
    %93 = arith.addf %32, %92 : vector<32x8xf32>
    %cst_43 = arith.constant 0.000000e+00 : f32
    %94 = vector.broadcast %cst_43 : f32 to vector<32x8xf32>
    %95 = arith.maximumf %93, %94 : vector<32x8xf32>
    %c0_44 = arith.constant 0 : index
    %c0_45 = arith.constant 0 : index
    %96 = vector.load %arg20[%c0_44, %c0_45] : memref<32x8xf32, #tpu.memory_space<vmem>>, vector<32x8xf32>
    tpu.vector_store %arg20[%c0_44, %c0_45], %95 {strides = array<i32>} : memref<32x8xf32, #tpu.memory_space<vmem>>, vector<32x8xf32>,
    %c1_i32 = arith.constant 1 : i32
    %97 = arith.cmpi eq, %arg0, %c1_i32 : i32
    %c6_i32 = arith.constant 6 : i32
    %98 = arith.cmpi eq, %arg1, %c6_i32 : i32
    %99 = arith.andi %97, %98 : i1
    %100 = arith.extui %99 : i1 to i32
    %c0_i32_46 = arith.constant 0 : i32
    %101 = arith.cmpi ne, %100, %c0_i32_46 : i32
    scf.if %101 {
      %102 = vector.extract_strided_slice %95 {offsets = [0, 0], sizes = [16, 8], strides = [1, 1]} : vector<32x8xf32> to vector<16x8xf32>
      %c0_47 = arith.constant 0 : index
      %c0_48 = arith.constant 0 : index
      %103 = vector.load %arg5[%c0_47, %c0_48] : memref<8x16xf32, #tpu.memory_space<vmem>>, vector<8x16xf32>
      %cst_49 = arith.constant dense<0.000000e+00> : vector<16x16xf32>
      %104 = tpu.matmul %102, %103, %cst_49 {dimension_numbers = #tpu.dot_dimension_numbers<[1], [0], [0], [1], [0, 0, 1, 1], [], []>} : vector<16x8xf32>, vector<8x16xf32>, vector<16x16xf32> -> vector<16x16xf32>
      %c0_50 = arith.constant 0 : index
      %c0_51 = arith.constant 0 : index
      %105 = vector.load %arg6[%c0_50, %c0_51] : memref<1x16xf32, #tpu.memory_space<vmem>>, vector<1x16xf32>
      %106 = vector.broadcast %105 : vector<1x16xf32> to vector<16x16xf32>
      %107 = arith.addf %104, %106 : vector<16x16xf32>
      %cst_52 = arith.constant 0.000000e+00 : f32
      %108 = vector.broadcast %cst_52 : f32 to vector<16x16xf32>
      %109 = arith.maximumf %107, %108 : vector<16x16xf32>
      %c0_53 = arith.constant 0 : index
      %c0_54 = arith.constant 0 : index
      %110 = vector.load %arg7[%c0_53, %c0_54] : memref<16x1xf32, #tpu.memory_space<vmem>>, vector<16x1xf32>
      %cst_55 = arith.constant dense<0.000000e+00> : vector<16x1xf32>
      %111 = tpu.matmul %109, %110, %cst_55 {dimension_numbers = #tpu.dot_dimension_numbers<[1], [0], [0], [1], [0, 0, 1, 1], [], []>} : vector<16x16xf32>, vector<16x1xf32>, vector<16x1xf32> -> vector<16x1xf32>
      %c0_56 = arith.constant 0 : index
      %c0_57 = arith.constant 0 : index
      %112 = vector.load %arg8[%c0_56, %c0_57] : memref<1x1xf32, #tpu.memory_space<vmem>>, vector<1x1xf32>
      %113 = vector.broadcast %112 : vector<1x1xf32> to vector<16x1xf32>
      %114 = arith.addf %111, %113 : vector<16x1xf32>
      %c0_58 = arith.constant 0 : index
      %c0_59 = arith.constant 0 : index
      %115 = vector.load %arg19[%c0_58, %c0_59] : memref<16x1xf32, #tpu.memory_space<vmem>>, vector<16x1xf32>
      tpu.vector_store %arg19[%c0_58, %c0_59], %114 {strides = array<i32>} : memref<16x1xf32, #tpu.memory_space<vmem>>, vector<16x1xf32>,
    } else {
    }
    return
  }
  func.func @transform_0(%arg0: i32, %arg1: i32) -> (i32, i32) {
    %c0_i32 = arith.constant 0 : i32
    %c0_i32_0 = arith.constant 0 : i32
    %c0_i32_1 = arith.constant 0 : i32
    return %c0_i32, %c0_i32_0 : i32, i32
  }
  func.func @transform_1(%arg0: i32, %arg1: i32) -> (i32, i32) {
    %c0_i32 = arith.constant 0 : i32
    %c0_i32_0 = arith.constant 0 : i32
    %c0_i32_1 = arith.constant 0 : i32
    return %c0_i32, %c0_i32_0 : i32, i32
  }
  func.func @transform_2(%arg0: i32, %arg1: i32) -> (i32, i32) {
    %c0_i32 = arith.constant 0 : i32
    %c0_i32_0 = arith.constant 0 : i32
    %c0_i32_1 = arith.constant 0 : i32
    return %c0_i32, %c0_i32_0 : i32, i32
  }
  func.func @transform_3(%arg0: i32, %arg1: i32) -> (i32, i32) {
    %c0_i32 = arith.constant 0 : i32
    %c0_i32_0 = arith.constant 0 : i32
    %c0_i32_1 = arith.constant 0 : i32
    return %c0_i32, %c0_i32_0 : i32, i32
  }
  func.func @transform_4(%arg0: i32, %arg1: i32) -> (i32, i32) {
    %c0_i32 = arith.constant 0 : i32
    %c0_i32_0 = arith.constant 0 : i32
    %c0_i32_1 = arith.constant 0 : i32
    return %c0_i32, %c0_i32_0 : i32, i32
  }
  func.func @transform_5(%arg0: i32, %arg1: i32) -> (i32, i32) {
    %c0_i32 = arith.constant 0 : i32
    %c0_i32_0 = arith.constant 0 : i32
    %c0_i32_1 = arith.constant 0 : i32
    return %c0_i32, %c0_i32_0 : i32, i32
  }
  func.func @transform_6(%arg0: i32, %arg1: i32) -> (i32, i32) {
    %c0_i32 = arith.constant 0 : i32
    %c0_i32_0 = arith.constant 0 : i32
    %c0_i32_1 = arith.constant 0 : i32
    return %c0_i32, %c0_i32_0 : i32, i32
  }
  func.func @transform_7(%arg0: i32, %arg1: i32) -> (i32, i32, i32) {
    %c0_i32 = arith.constant 0 : i32
    %c0_i32_0 = arith.constant 0 : i32
    %c0_i32_1 = arith.constant 0 : i32
    return %arg1, %c0_i32, %c0_i32_0 : i32, i32, i32
  }
  func.func @transform_8(%arg0: i32, %arg1: i32) -> (i32, i32, i32) {
    %c0_i32 = arith.constant 0 : i32
    %c0_i32_0 = arith.constant 0 : i32
    %c0_i32_1 = arith.constant 0 : i32
    return %arg1, %c0_i32, %c0_i32_0 : i32, i32, i32
  }
  func.func @transform_9(%arg0: i32, %arg1: i32) -> (i32, i32, i32) {
    %c0_i32 = arith.constant 0 : i32
    %c0_i32_0 = arith.constant 0 : i32
    %c0_i32_1 = arith.constant 0 : i32
    return %arg1, %c0_i32, %c0_i32_0 : i32, i32, i32
  }
  func.func @transform_10(%arg0: i32, %arg1: i32) -> (i32, i32, i32) {
    %c0_i32 = arith.constant 0 : i32
    %c0_i32_0 = arith.constant 0 : i32
    %c0_i32_1 = arith.constant 0 : i32
    return %arg1, %c0_i32, %c0_i32_0 : i32, i32, i32
  }
  func.func @transform_11(%arg0: i32, %arg1: i32) -> (i32, i32, i32) {
    %c0_i32 = arith.constant 0 : i32
    %c0_i32_0 = arith.constant 0 : i32
    %c0_i32_1 = arith.constant 0 : i32
    return %arg1, %c0_i32, %c0_i32_0 : i32, i32, i32
  }
  func.func @transform_12(%arg0: i32, %arg1: i32) -> (i32, i32, i32) {
    %c0_i32 = arith.constant 0 : i32
    %c0_i32_0 = arith.constant 0 : i32
    %c0_i32_1 = arith.constant 0 : i32
    return %arg1, %c0_i32, %c0_i32_0 : i32, i32, i32
  }
  func.func @transform_13(%arg0: i32, %arg1: i32) -> (i32, i32, i32) {
    %c0_i32 = arith.constant 0 : i32
    %c0_i32_0 = arith.constant 0 : i32
    %c0_i32_1 = arith.constant 0 : i32
    return %arg1, %c0_i32, %c0_i32_0 : i32, i32, i32
  }
  func.func @transform_14(%arg0: i32, %arg1: i32) -> (i32, i32, i32) {
    %c0_i32 = arith.constant 0 : i32
    %c0_i32_0 = arith.constant 0 : i32
    %c0_i32_1 = arith.constant 0 : i32
    return %arg1, %c0_i32, %c0_i32_0 : i32, i32, i32
  }
  func.func @transform_15(%arg0: i32, %arg1: i32) -> (i32, i32, i32) {
    %c0_i32 = arith.constant 0 : i32
    %c0_i32_0 = arith.constant 0 : i32
    %c0_i32_1 = arith.constant 0 : i32
    return %arg1, %c0_i32, %c0_i32_0 : i32, i32, i32
  }
  func.func @transform_16(%arg0: i32, %arg1: i32) -> (i32, i32, i32) {
    %c0_i32 = arith.constant 0 : i32
    %c0_i32_0 = arith.constant 0 : i32
    %c0_i32_1 = arith.constant 0 : i32
    return %arg1, %c0_i32, %c0_i32_0 : i32, i32, i32
  }
  func.func @transform_17(%arg0: i32, %arg1: i32) -> (i32, i32) {
    %c0_i32 = arith.constant 0 : i32
    %c0_i32_0 = arith.constant 0 : i32
    %c0_i32_1 = arith.constant 0 : i32
    return %c0_i32, %c0_i32_0 : i32, i32
  }
}

</mosaic_0001>

<bundles_post_ra>
// kernel: tpu_custom_call.1
= control target key start
LH: loop header
LB: loop body
LE: loop exit
PB: predicated region body
PF: predicated region fallthrough
CT: control target
= control target key end

     0   :  { %s2352_s26 = smov 0   ;;  %s2354_s27 = smov 0   ;;  %s2695_s0 = inlined_call_operand.vmem [shape: f32[32,4], index: 0, kind: input, shape index: {}]   ;;  %s2696_s1 = inlined_call_operand.vmem [shape: f32[4,8], index: 1, kind: input, shape index: {}]   ;;  %s2697_s2 = inlined_call_operand.vmem [shape: f32[1,8], index: 2, kind: input, shape index: {}]   ;;  %s2698_s3 = inlined_call_operand.vmem [shape: f32[8,16], index: 3, kind: input, shape index: {}]   ;;  %s2699_s4 = inlined_call_operand.vmem [shape: f32[1,16], index: 4, kind: input, shape index: {}]   ;;  %s2700_s5 = inlined_call_operand.vmem [shape: f32[16,1], index: 5, kind: input, shape index: {}]   ;;  %s2701_s6 = inlined_call_operand.<no memory space> [shape: f32[1,1], index: 6, kind: input, shape index: {}]   ;;  %s2702_s7 = inlined_call_operand.vmem [shape: f32[7,24,6], index: 7, kind: input, shape index: {}]   ;;  %s2703_s8 = inlined_call_operand.vmem [shape: s32[7,24,1], index: 8, kind: input, shape index: {}]   ;;  %s2704_s9 = inlined_call_operand.vmem [shape: s32[7,1,24], index: 9, kind: input, shape index: {}]   ;;  %s2705_s10 = inlined_call_operand.vmem [shape: f32[7,32,8], index: 10, kind: input, shape index: {}]   ;;  %s2706_s11 = inlined_call_operand.vmem [shape: f32[7,6,16], index: 11, kind: input, shape index: {}]   ;;  %s2707_s12 = inlined_call_operand.vmem [shape: f32[7,1,16], index: 12, kind: input, shape index: {}]   ;;  %s2708_s13 = inlined_call_operand.vmem [shape: f32[7,16,16], index: 13, kind: input, shape index: {}]   ;;  %s2709_s14 = inlined_call_operand.vmem [shape: f32[7,1,16], index: 14, kind: input, shape index: {}]   ;;  %s2710_s15 = inlined_call_operand.vmem [shape: f32[7,16,64], index: 15, kind: input, shape index: {}]   ;;  %s2711_s16 = inlined_call_operand.vmem [shape: f32[7,1,64], index: 16, kind: input, shape index: {}]   ;;  %s2712_s17 = inlined_call_operand.vmem [shape: f32[16,1], index: 17, kind: output, shape index: {}]  }
   0x1   :  { %2721 = sst [smem:[#allocation11_spill]] %s2695_s0  ;;  %v22_v0 = vstv %s2701_s6  ;;  %s2356_s28 = smov 0  }
   0x2   :  { %2722 = sst [smem:[#allocation12_spill]] %s2696_s1  ;;  %23 = vst [vmem:[#allocation3] sm:$0x1] %v22_v0  ;;  %s2358_s29 = smov 0  }
   0x3   :  { %2723 = sst [smem:[#allocation13_spill]] %s2698_s3  ;;  %s2360_s0 = smov 0  }
   0x4   :  { %2724 = sst [smem:[#allocation14_spill]] %s2699_s4 }
   0x5   :  { %2725 = sst [smem:[#allocation15_spill]] %s2700_s5 }
   0x6   :  { %2726 = sst [smem:[#allocation16_spill]] %s2702_s7 }
   0x7   :  { %2727 = sst [smem:[#allocation17_spill]] %s2712_s17 }
   0x8 LB: > { %2728 = sst [smem:[#allocation4_spill]] %s2224_s26  ;;  %s38_s6 = sadd.s32 1, %s2232_s28  ;;  %s2240_s0 = sphi %s2360_s0, %s29_s0   ;;  %s2236_s29 = sphi %s2358_s29, %s2752_s29   ;;  %s2232_s28 = sphi %s2356_s28, %s2751_s28   ;;  %s2228_s27 = sphi %s2354_s27, %s2750_s27   ;;  %s2224_s26 = sphi %s2352_s26, %s2749_s26  }
   0x9   : > { %2729 = sst [smem:[#allocation5_spill]] %s2228_s27  ;;  %s41_s30 = sadd.s32 1, %s2236_s29 }
   0xa   : > { %2730 = sst [smem:[#allocation6_spill]] %s2232_s28  ;;  %p39_p0 = scmp.ge.s32.totalorder %s38_s6, 7 }
   0xb   : > { %2731 = sst [smem:[#allocation7_spill]] %s2236_s29  ;;  %p1941_p1 = scmp.ge.s32.totalorder %s2240_s0, 1 }
   0xc   : > { %2732 = sst [smem:[#allocation8_spill]] %s2240_s0  ;;  %p577_p2 = scmp.lt.s32.totalorder %s2240_s0, 15 }
   0xd   : > { %s2754_s6 = smov (%p39_p0, %s38_s6), 0  ;;  %s2756_s30 = smov (!%p39_p0, %s41_s30), %s2236_s29 }
   0xe   : > { %2733 = sst [smem:[#allocation9_spill]] %s2754_s6  ;;  %p578_p3 = pnand %p1941_p1, %p577_p2 }
   0xf   : > { %p43_p4 = scmp.ge.s32.totalorder %s2756_s30, 2  ;;  %p660_p5 = scmp.lt.s32.totalorder (!%p578_p3), %s2224_s26, 6 }
  0x10   : > { %581 = sbr.rel (%p578_p3) target bundleno = 1596 (0x63c), region = 88  ;;  %p701_p6 = scmp.eq.s32.totalorder (!%p578_p3), %s2228_s27, 0 }
  0x11   : > { %s2758_s30 = smov (%p43_p4, %s2756_s30), 0  ;;  %p702_p7 = scmp.eq.s32.totalorder (!%p578_p3), %s2224_s26, 0 }
  0x12   : > { %2734 = sst [smem:[#allocation10_spill]] %s2758_s30 }
  0x13   : > { %p2392_p8 = pnand (!%p578_p3), %p702_p7, %p701_p6  ;;  %s2736_s7 = sld [smem:[#allocation16_spill]] (!%p578_p3) }
  0x15   : > { %s2390_s18 = scalar_select %p660_p5, %s2224_s26, 6 }
  0x16   : > { %s2737_s27 = sld [smem:[#allocation12_spill]] (!%p2392_p8) }
  0x17   : > { %s2119_s1 = smul.u32 24, %s2390_s18  ;;  %s1986_s23 = sshll.u32 %s2390_s18, 5 }
  0x18   : > { %s1946_s24 = sshll.u32 %s2390_s18, 3  ;;  %s2416_s5 = scalar_lea.vmem %s2705_s10, %s1986_s23 }
  0x19   : > { %s2406_s6 = scalar_lea.vmem %s2736_s7, %s2119_s1  ;;  %s2411_s0 = scalar_lea.vmem %s2703_s8, %s2119_s1 }
  0x1a   : > { %s2421_s21 = scalar_lea.vmem %s2706_s11, %s1946_s24  ;;  %s1987_s25 = sshll.u32 %s2390_s18, 4 }
  0x1b   : > { %s2431_s28 = scalar_lea.vmem %s2708_s13, %s1987_s25  ;;  %s692_s4 = scalar_lea.vmem %s2709_s14, %s2390_s18 }
  0x1c   : > { %s2440_s3 = scalar_lea.vmem %s2710_s15, %s1987_s25  ;;  %s700_s26 = scalar_lea.vmem %s2711_s16, %s2390_s18 }
  0x1d   : > { %706 = sbr.rel (%p2392_p8) target bundleno = 236 (0xec), region = 92  ;;  %s2738_s1 = sld [smem:[#allocation11_spill]] (!%p2392_p8) }
  0x22   : > { %v711_v1 = vld [vmem:[%s2737_s27] sm:$0xf]  ;;  %vm732_vm0 = vcmask 1043456   ;;  %vm719_vm1 = vcmask 31744   ;;  %vm821_vm2 = vcmask 64512  }
  0x23   : > { %v707_v2 = vld [vmem:[%s2738_s1] sm:$0xff]  ;;  %v709_v3 = vld [vmem:[%s2738_s1 + $0x10] sm:$0xff]  ;;  %2029 = vmatprep.subr.msk.mxu0 %vm732_vm0, %v711_v1  ;;  %2115 = vmatprep.subr.msk.mxu1 %vm732_vm0, %v711_v1  ;;  %v708_v4 = vld [vmem:[%s2738_s1 + $0x8] sm:$0xff] }
  0x24   : > { %v710_v5 = vld [vmem:[%s2738_s1 + $0x18] sm:$0xff]  ;;  %2030 = vmatpush3.msk.msra.mxu0 %vm732_vm0, %v711_v1  ;;  %2116 = vmatpush3.msk.msra.mxu1 %vm732_vm0, %v711_v1  ;;  %v1951_v6 = vld [vmem:[%s2697_s2] ss:$0 sm:$0xff] }
  0x25   : > { %2031 = vmatprep.mubr.msk.f32.mxu0 %vm719_vm1, %v707_v2  ;;  %2034 = vmatprep.mubr.msk.f32.mxu1 %vm719_vm1, %v709_v3 }
  0x26   : > { %2032 = vmatmul.mubr.msk.f32.vlgmr.msra.gmra.mxu0 %vm719_vm1, %v708_v4  ;;  %2035 = vmatmul.mubr.msk.f32.vlgmr.msra.gmra.mxu1 %vm719_vm1, %v710_v5 }
  0xe6   : > { %v2033_v7 = vpop.f32.mrf.mxu0  ;;  %v2036_v8 = vpop.f32.mrf.mxu1 }
  0xe7   : > { %v808_v9 = vadd.f32 %v2033_v7, %v1951_v6  ;;  %v818_v10 = vadd.f32 %v2036_v8, %v1951_v6 }
  0xe8   : > { %v802_v11 = vpop.f32.mrf.mxu0  ;;  %v812_v12 = vpop.f32.mrf.mxu1 }
  0xe9   : > { %823 = vst.msk [vmem:[#allocation2 + $0x8] sm:$0xff] %vm821_vm2, %v808_v9  ;;  %825 = vst.msk [vmem:[#allocation2 + $0x18] sm:$0xff] %vm821_vm2, %v818_v10  ;;  %v803_v13 = vadd.f32 %v1951_v6, %v802_v11  ;;  %v813_v14 = vadd.f32 %v1951_v6, %v812_v12 }
  0xeb   : > { %822 = vst.msk [vmem:[#allocation2] sm:$0xff] %vm821_vm2, %v803_v13  ;;  %824 = vst.msk [vmem:[#allocation2 + $0x10] sm:$0xff] %vm821_vm2, %v813_v14 }
  0xec PF: > { %v829_v15 = vld [vmem:[%s2421_s21] sm:$0x3f]  ;;  %vm847_vm3 = vcmask 1045504   ;;  %v2242_v17 = vmov 0.0   ;;  %vm2243_vm4 = vmmov 0   ;;  %vm837_vm5 = vcmask 48128   ;;  %s2739_s21 = scalar_lea.vmem %s2707_s12, %s2390_s18  ;;  %s2740_s20 = scalar_lea.vmem %s2704_s9, %s2390_s18 }
  0xed   : > { %v826_v16 = vld [vmem:[%s2406_s6] sm:$0xff]  ;;  %2037 = vmatprep.subr.mxu0 %v2242_v17  ;;  %2039 = vmatprep.mubr.msk.f32.mxu0 %vm2243_vm4, %v2242_v17  ;;  %v828_v18 = vld [vmem:[%s2406_s6 + $0x10] sm:$0xff]  ;;  %v827_v20 = vld [vmem:[%s2406_s6 + $0x8] sm:$0xff]  ;;  %v2244_v22 = vmov 0   ;;  %vm943_vm6 = vcmask 130048   ;;  %v1141_v33 = vlaneseq  ;;  %vm1158_vm8 = vcmask 261120  }
  0xee   : > { %2038 = vmatpush3.msk.msra.mxu0 %vm847_vm3, %v829_v15  ;;  %2117 = vmatprep.subr.mxu1 %v2242_v17  ;;  %v1138_v19 = vld [vmem:[%s2411_s0] sm:$0xff]  ;;  %v1140_v21 = vld [vmem:[%s2411_s0 + $0x10] sm:$0xff]  ;;  %v1139_v23 = vld [vmem:[%s2411_s0 + $0x8] sm:$0xff]  ;;  %v2245_v53 = vmov 1   ;;  %v2246_v6 = vmov 2   ;;  %v2247_v9 = vmov 3  }
  0xef   : > { %2040 = vmatmul.mubr.msk.f32.vlgmr.msra.gmra.mxu0 %vm837_vm5, %v826_v16  ;;  %2118 = vmatpush3.msk.msra.mxu1 %vm847_vm3, %v829_v15  ;;  %v935_v24 = vld [vmem:[%s2431_s28 + $0x8] sm:$0xff]  ;;  %v934_v25 = vld [vmem:[%s2431_s28] sm:$0xff]  ;;  %v1142_v42 = vand.u32 127, %v1141_v33  ;;  %v2248_v11 = vmov 4   ;;  %v2249_v12 = vmov 5   ;;  %v2250_v13 = vmov 6  }
  0xf0   : > { %2042 = vmatprep.mubr.msk.f32.mxu0 %vm2243_vm4, %v2242_v17  ;;  %2045 = vmatprep.mubr.msk.f32.mxu1 %vm2243_vm4, %v2242_v17  ;;  %v1957_v26 = vld [vmem:[%s2739_s21] ss:$0 sm:$0xff]  ;;  %v2501_v32 = vld [vmem:[#allocation2 + $0x18] sm:$0xff]  ;;  %v2511_v43 = vld [vmem:[#allocation2 + $0x8] sm:$0xff]  ;;  %v2251_v14 = vmov 7   ;;  %s2252_s27 = smov 112  }
  0xf1   : > { %2046 = vmatmul.mubr.msk.f32.vlgmr.msra.gmra.mxu1 %vm837_vm5, %v828_v18  ;;  %2177 = vset.pattern.permute.xlu0 %v2244_v22  ;;  %v1037_v51 = vld [vmem:[%s2440_s3 + $0x8] sm:$0xff]  ;;  %v1036_v52 = vld [vmem:[%s2440_s3] sm:$0xff]  ;;  %s2253_s29 = smov 120   ;;  %s2255_s17 = smov 104   ;;  %vm1494_vm12 = vcmask 195584   ;;  %vm1608_vm0 = vcmask 64512  }
  0xf2   : > { %1144 = vperm.xlu0 %2177, %v1138_v19   ;;  %2178 = vset.pattern.permute.xlu1 %v2244_v22  ;;  %v2504_v38 = vld [vmem:[#allocation2 + $0x10] sm:$0xff]  ;;  %v2516_v45 = vld [vmem:[#allocation2] sm:$0xff]  ;;  %s2256_s25 = smov 88   ;;  %s2257_s23 = smov 80  }
  0xf3   : > { %2043 = vmatmul.mubr.msk.f32.gmra.mxu0 %vm837_vm5, %v827_v20  ;;  %1150 = vperm.xlu1 %2178, %v1140_v21   ;;  %v1962_v54 = vld [vmem:[%s692_s4] ss:$0 sm:$0xff]  ;;  %s2258_s18 = smov 72   ;;  %s2741_s30 = sld [smem:[#allocation5_spill]] }
  0xf4   : > { %2048 = vmatprep.subr.mxu1 %v2242_v17  ;;  %2052 = vmatprep.mubr.msk.f32.mxu1 %vm2243_vm4, %v2242_v17  ;;  %s2742_s22 = sld [smem:[#allocation4_spill]] }
  0xf5   : > { %2061 = vmatprep.subr.mxu0 %v2242_v17  ;;  %2065 = vmatprep.mubr.msk.f32.mxu0 %vm2243_vm4, %v2242_v17 }
  0xf6   : > { %1147 = vperm.xlu0 %2177, %v1139_v23   ;;  %2049 = vmatpush3.msra.mxu1 %v935_v24 }
  0xf7   : > { %2050 = vmatprep.subr.mxu1 %v2242_v17  ;;  %2062 = vmatpush3.msra.mxu0 %v1037_v51 }
  0xf8   : > { %2051 = vmatpush3.msra.mxu1 %v934_v25  ;;  %2063 = vmatprep.subr.mxu0 %v2242_v17 }
  0xf9   : > { %2074 = vmatprep.subr.mxu1 %v2242_v17  ;;  %2064 = vmatpush3.msra.mxu0 %v1036_v52  ;;  %p1613_p9 = scmp.eq.s32.totalorder %s2741_s30, 1 }
  0xfa   : > { %2179 = vset.pattern.permute.xlu1 %v2245_v53  ;;  %2185 = vset.pattern.permute.xlu0 %v2245_v53  ;;  %p1614_p10 = scmp.eq.s32.totalorder %s2742_s22, 6 }
  0xfc   : > { %p2640_p11 = pnand %p1614_p10, %p1613_p9 }
  0xfd   : > { %s2744_s21 = sld [smem:[#allocation13_spill]] (!%p2640_p11) }
  0xfe   : > { %s2745_s4 = sld [smem:[#allocation15_spill]] (!%p2640_p11) }
  0xff   : > { %s2747_s24 = sld [smem:[#allocation17_spill]] (!%p2640_p11) }
 0x16d   : > { %v1145_v40 = vpop.permute.xlu0 %1144 }
 0x16e   : > { %vm1152_vm7 = vcmp.eq.s32.totalorder %v1142_v42, %v1145_v40  ;;  %v1151_v48 = vpop.permute.xlu1 %1150 }
 0x16f   : > { %v1155_v47 = vsel %vm1152_vm7, 1.0, %v2242_v17  ;;  %vm1154_vm10 = vcmp.eq.s32.totalorder %v1142_v42, %v1151_v48 }
 0x170   : > { %v1157_v50 = vsel %vm1154_vm10, 1.0, %v2242_v17 }
 0x171   : > { %v1148_v46 = vpop.permute.xlu0 %1147 }
 0x172   : > { %vm1153_vm9 = vcmp.eq.s32.totalorder %v1142_v42, %v1148_v46 }
 0x173   : > { %v1156_v49 = vsel %vm1153_vm9, 1.0, %v2242_v17 }
 0x1af   : > { %v917_v27 = vpop.f32.mrf.mxu0 }
 0x1b0   : > { %v918_v28 = vadd.f32 %v1957_v26, %v917_v27 }
 0x1b1   : > { %v2041_v29 = vpop.f32.mrf.mxu0  ;;  %v927_v30 = vpop.f32.mrf.mxu1 }
 0x1b2   : > { %v931_v31 = vmax.f32 %v918_v28, 0.0  ;;  %v928_v37 = vadd.f32 %v1957_v26, %v927_v30 }
 0x1b3   : > { %v922_v34 = vpop.f32.mrf.mxu0  ;;  %v2047_v35 = vpop.f32.mrf.mxu1 }
 0x1b4   : > { %v923_v36 = vadd.f32 %v1957_v26, %v922_v34  ;;  %2053 = vmatmul.mubr.msk.f32.vlgmr.msra.gmra.mxu1 %vm943_vm6, %v931_v31  ;;  %v933_v44 = vmax.f32 %v928_v37, 0.0  ;;  %v1966_v26 = vld [vmem:[%s700_s26] ss:$0 sm:$0xff]  ;;  %s2254_s26 = smov 96  }
 0x1b5   : > { %v2044_v39 = vpop.f32.mrf.mxu0  ;;  %2055 = vmatprep.mubr.msk.f32.mxu1 %vm2243_vm4, %v2242_v17  ;;  %2075 = vmatpush3.msra.mxu1 %v2501_v32 }
 0x1b6   : > { %v932_v41 = vmax.f32 %v923_v36, 0.0  ;;  %2076 = vmatprep.subr.mxu1 %v2242_v17 }
 0x1b7   : > { %2077 = vmatpush3.msra.mxu1 %v2504_v38 }
 0x1b8   : > { %2056 = vmatmul.mubr.msk.f32.gmra.mxu1 %vm943_vm6, %v932_v41  ;;  %2078 = vmatprep.subr.mxu1 %v2242_v17 }
 0x1b9   : > { %2058 = vmatprep.mubr.msk.f32.mxu1 %vm2243_vm4, %v2242_v17  ;;  %2079 = vmatpush3.msra.mxu1 %v2511_v43 }
 0x1ba   : > { %2080 = vmatprep.subr.mxu1 %v2242_v17 }
 0x1bb   : > { %2081 = vmatpush3.msra.mxu1 %v2516_v45 }
 0x1bc   : > { %2059 = vmatmul.mubr.msk.f32.gmra.mxu1 %vm943_vm6, %v933_v44 }
 0x1bd   : > { %2082 = vmatprep.mubr.msk.f32.mxu1 %vm2243_vm4, %v2242_v17 }
 0x1c0   : > { %2083 = vmatmul.mubr.msk.f32.vlgmr.msra.gmra.mxu1 %vm1158_vm8, %v1155_v47 }
 0x1c1   : > { %2085 = vmatprep.mubr.msk.f32.mxu1 %vm2243_vm4, %v2242_v17 }
 0x1c4   : > { %2086 = vmatmul.mubr.msk.f32.gmra.mxu1 %vm1158_vm8, %v1156_v49 }
 0x1c5   : > { %2088 = vmatprep.mubr.msk.f32.mxu1 %vm2243_vm4, %v2242_v17 }
 0x1c8   : > { %2089 = vmatmul.mubr.msk.f32.gmra.mxu1 %vm1158_vm8, %v1157_v50 }
 0x274   : > { %v1019_v55 = vpop.f32.mrf.mxu1 }
 0x275   : > { %v1020_v56 = vadd.f32 %v1962_v54, %v1019_v55 }
 0x276   : > { %v2054_v57 = vpop.f32.mrf.mxu1 }
 0x277   : > { %v1033_v58 = vmax.f32 %v1020_v56, 0.0 }
 0x278   : > { %v1024_v59 = vpop.f32.mrf.mxu1 }
 0x279   : > { %v1025_v60 = vadd.f32 %v1962_v54, %v1024_v59  ;;  %2066 = vmatmul.mubr.msk.f32.vlgmr.msra.gmra.mxu0 %vm943_vm6, %v1033_v58 }
 0x27a   : > { %v2057_v61 = vpop.f32.mrf.mxu1  ;;  %2068 = vmatprep.mubr.msk.f32.mxu0 %vm2243_vm4, %v2242_v17 }
 0x27b   : > { %v1034_v62 = vmax.f32 %v1025_v60, 0.0 }
 0x27c   : > { %v1029_v63 = vpop.f32.mrf.mxu1 }
 0x27d   : > { %v1030_v0 = vadd.f32 %v1962_v54, %v1029_v63  ;;  %2069 = vmatmul.mubr.msk.f32.gmra.mxu0 %vm943_vm6, %v1034_v62  ;;  %v1478_v63 = vshrl.u32 %v1141_v33, 7 }
 0x27e   : > { %v2060_v1 = vpop.f32.mrf.mxu1  ;;  %2071 = vmatprep.mubr.msk.f32.mxu0 %vm2243_vm4, %v2242_v17 }
 0x27f   : > { %v1035_v2 = vmax.f32 %v1030_v0, 0.0 }
 0x280   : > { %v1234_v3 = vpop.f32.mrf.mxu1 }
 0x281   : > { %2072 = vmatmul.mubr.msk.f32.gmra.mxu0 %vm943_vm6, %v1035_v2  ;;  %1267 = vperm.xlu1 %2179, %v1234_v3  }
 0x282   : > { %v2084_v4 = vpop.f32.mrf.mxu1 }
 0x283   : > { %v2597_v4 = vadd.s32 8, %v1478_v63 }
 0x284   : > { %v1239_v5 = vpop.f32.mrf.mxu1 }
 0x285   : > { %2180 = vset.pattern.permute.xlu1 %v2246_v6  ;;  %1271 = vperm.xlu0 %2185, %v1239_v5  }
 0x286   : > { %1297 = vperm.xlu1 %2180, %v1234_v3   ;;  %v2087_v7 = vpop.f32.mrf.mxu1 }
 0x287   : > { %v2606_v7 = vadd.s32 16, %v1478_v63 }
 0x288   : > { %v1244_v8 = vpop.f32.mrf.mxu1 }
 0x289   : > { %2186 = vset.pattern.permute.xlu0 %v2246_v6 }
 0x28a   : > { %2181 = vset.pattern.permute.xlu1 %v2247_v9  ;;  %1301 = vperm.xlu0 %2186, %v1239_v5   ;;  %v2090_v10 = vpop.f32.mrf.mxu1 }
 0x28b   : > { %1327 = vperm.xlu1 %2181, %v1234_v3  }
 0x28e   : > { %2187 = vset.pattern.permute.xlu0 %v2247_v9 }
 0x28f   : > { %2182 = vset.pattern.permute.xlu1 %v2248_v11  ;;  %1331 = vperm.xlu0 %2187, %v1239_v5  }
 0x290   : > { %1357 = vperm.xlu1 %2182, %v1234_v3  }
 0x293   : > { %2188 = vset.pattern.permute.xlu0 %v2248_v11 }
 0x294   : > { %2183 = vset.pattern.permute.xlu1 %v2249_v12  ;;  %1361 = vperm.xlu0 %2188, %v1239_v5  }
 0x295   : > { %1387 = vperm.xlu1 %2183, %v1234_v3  }
 0x298   : > { %2189 = vset.pattern.permute.xlu0 %v2249_v12 }
 0x299   : > { %2184 = vset.pattern.permute.xlu1 %v2250_v13  ;;  %1391 = vperm.xlu0 %2189, %v1239_v5  }
 0x29a   : > { %1417 = vperm.xlu1 %2184, %v1234_v3  }
 0x29d   : > { %2190 = vset.pattern.permute.xlu0 %v2250_v13 }
 0x29e   : > { %2192 = vset.pattern.permute.xlu1 %v2245_v53  ;;  %1421 = vperm.xlu0 %2190, %v1239_v5  }
 0x29f   : > { %1275 = vperm.xlu1 %2192, %v1244_v8  }
 0x2a2   : > { %2191 = vset.pattern.permute.xlu0 %v2251_v14 }
 0x2a3   : > { %1451 = vperm.xlu0 %2191, %v1239_v5   ;;  %2193 = vset.pattern.permute.xlu1 %v2246_v6 }
 0x2a4   : > { %1305 = vperm.xlu1 %2193, %v1244_v8  }
 0x2a7   : > { %2199 = vset.pattern.permute.xlu0 %v2244_v22 }
 0x2a8   : > { %1255 = vperm.xlu0 %2199, %v1239_v5   ;;  %2194 = vset.pattern.permute.xlu1 %v2247_v9 }
 0x2a9   : > { %1335 = vperm.xlu1 %2194, %v1244_v8  }
 0x2ac   : > { %2201 = vset.pattern.permute.xlu0 %v2251_v14 }
 0x2ad   : > { %2195 = vset.pattern.permute.xlu1 %v2248_v11 }
 0x2ae   : > { %1365 = vperm.xlu1 %2195, %v1244_v8  }
 0x2b2   : > { %2196 = vset.pattern.permute.xlu1 %v2249_v12 }
 0x2b3   : > { %1395 = vperm.xlu1 %2196, %v1244_v8  }
 0x2b7   : > { %2197 = vset.pattern.permute.xlu1 %v2250_v13 }
 0x2b8   : > { %1425 = vperm.xlu1 %2197, %v1244_v8  }
 0x2bc   : > { %2198 = vset.pattern.permute.xlu1 %v2251_v14 }
 0x2bd   : > { %1455 = vperm.xlu1 %2198, %v1244_v8  }
 0x2c1   : > { %1447 = vperm.xlu1 %2198, %v1234_v3  }
 0x2c5   : > { %2200 = vset.pattern.permute.xlu1 %v2244_v22 }
 0x2c6   : > { %1250 = vperm.xlu1 %2200, %v1234_v3   ;;  %v2595_v3 = vld [vmem:[%s2740_s20] ss:$0 sm:$0xff] }
 0x2c7   : > { %vm1486_vm11 = vcmp.eq.s32.totalorder %v1478_v63, %v2595_v3  ;;  %vm1487_vm13 = vcmp.eq.s32.totalorder %v2597_v4, %v2595_v3  ;;  %vm1488_vm14 = vcmp.eq.s32.totalorder %v2606_v7, %v2595_v3  ;;  %v1593_v4 = vld [vmem:[%s2416_s5 + $0x8] sm:$0xff] }
 0x2c8   : > { %v1490_v6 = vsel %vm1486_vm11, 1.0, %v2242_v17 }
 0x2c9   : > { %2097 = vmatprep.mubr.msk.f32.mxu0 %vm1494_vm12, %v1490_v6  ;;  %v1492_v6 = vsel %vm1488_vm14, 1.0, %v2242_v17 }
 0x2ca   : > { %1260 = vperm.xlu1 %2200, %v1244_v8   ;;  %v2609_v8 = vadd.s32 24, %v1478_v63 }
 0x2cc   : > { %vm1489_vm15 = vcmp.eq.s32.totalorder %v2609_v8, %v2595_v3 }
 0x2fc   : > { %v1268_v15 = vpop.permute.xlu1 %1267 }
 0x300   : > { %v1272_v21 = vpop.permute.xlu0 %1271 }
 0x301   : > { %v1298_v16 = vpop.permute.xlu1 %1297 }
 0x305   : > { %v1302_v24 = vpop.permute.xlu0 %1301 }
 0x306   : > { %v1328_v18 = vpop.permute.xlu1 %1327 }
 0x30a   : > { %v1332_v27 = vpop.permute.xlu0 %1331 }
 0x30b   : > { %v1358_v19 = vpop.permute.xlu1 %1357 }
 0x30f   : > { %v1362_v36 = vpop.permute.xlu0 %1361 }
 0x310   : > { %v1388_v20 = vpop.permute.xlu1 %1387 }
 0x314   : > { %v1392_v49 = vpop.permute.xlu0 %1391 }
 0x315   : > { %v2550_v23 = vpop.permute.xlu1 %1417 }
 0x319   : > { %v1422_v53 = vpop.permute.xlu0 %1421 }
 0x31a   : > { %v1276_v25 = vpop.permute.xlu1 %1275 }
 0x31e   : > { %v1452_v9 = vpop.permute.xlu0 %1451 }
 0x31f   : > { %v1306_v30 = vpop.permute.xlu1 %1305 }
 0x324   : > { %v1336_v44 = vpop.permute.xlu1 %1335 }
 0x329   : > { %v1366_v50 = vpop.permute.xlu1 %1365 }
 0x32e   : > { %v1396_v57 = vpop.permute.xlu1 %1395 }
 0x333   : > { %v1426_v60 = vpop.permute.xlu1 %1425 }
 0x338   : > { %v1456_v2 = vpop.permute.xlu1 %1455 }
 0x339   : > { %v1120_v28 = vpop.f32.mrf.mxu0 }
 0x33a   : > { %v2557_v22 = vadd.f32 %v1966_v26, %v1120_v28 }
 0x33b   : > { %v2067_v29 = vpop.f32.mrf.mxu0 }
 0x33c   : > { %v1308_v31 = vmul.f32 %v1298_v16, %v2557_v22  ;;  %v1278_v34 = vmul.f32 %v1268_v15, %v2557_v22  ;;  %v1368_v40 = vmul.f32 %v1358_v19, %v2557_v22  ;;  %v1338_v41 = vmul.f32 %v1328_v18, %v2557_v22  ;;  %v1448_v12 = vpop.permute.xlu1 %1447  ;;  %v1256_v15 = vpop.permute.xlu0 %1255 }
 0x33d   : > { %v1125_v35 = vpop.f32.mrf.mxu0  ;;  %v1398_v47 = vmul.f32 %v1388_v20, %v2557_v22  ;;  %v1428_v11 = vmul.f32 %v2550_v23, %v2557_v22  ;;  %v1458_v13 = vmul.f32 %v1448_v12, %v2557_v22 }
 0x33e   : > { %1314 = vrot.lane.b32.xlu1 %v1308_v31, %s2252_s27  ;;  %1284 = vrot.lane.b32.xlu0 %v1278_v34, %s2253_s29  ;;  %v2563_v39 = vadd.f32 %v1966_v26, %v1125_v35 }
 0x33f   : > { %v2070_v37 = vpop.f32.mrf.mxu0 }
 0x340   : > { %v1309_v48 = vmul.f32 %v1302_v24, %v2563_v39  ;;  %v1369_v51 = vmul.f32 %v1362_v36, %v2563_v39  ;;  %v1279_v52 = vmul.f32 %v1272_v21, %v2563_v39  ;;  %v1429_v55 = vmul.f32 %v1422_v53, %v2563_v39 }
 0x341   : > { %v1130_v42 = vpop.f32.mrf.mxu0  ;;  %v1339_v56 = vmul.f32 %v1332_v27, %v2563_v39  ;;  %v1399_v58 = vmul.f32 %v1392_v49, %v2563_v39  ;;  %v1459_v10 = vmul.f32 %v1452_v9, %v2563_v39  ;;  %v1251_v14 = vpop.permute.xlu1 %1250  ;;  %v1264_v27 = vmul.f32 %v1256_v15, %v2563_v39 }
 0x342   : > { %1374 = vrot.lane.b32.xlu1 %v1368_v40, %s2254_s26  ;;  %1344 = vrot.lane.b32.xlu0 %v1338_v41, %s2255_s17  ;;  %v2575_v54 = vadd.f32 %v1966_v26, %v1130_v42  ;;  %v1263_v31 = vmul.f32 %v1251_v14, %v2557_v22  ;;  %v1493_v9 = vsel %vm1489_vm15, 1.0, %v2242_v17 }
 0x343   : > { %v2073_v46 = vpop.f32.mrf.mxu0 }
 0x344   : > { %v1280_v59 = vmul.f32 %v1276_v25, %v2575_v54  ;;  %v1340_v61 = vmul.f32 %v1336_v44, %v2575_v54  ;;  %v1310_v62 = vmul.f32 %v1306_v30, %v2575_v54  ;;  %v1400_v0 = vmul.f32 %v1396_v57, %v2575_v54 }
 0x345   : > { %v1370_v1 = vmul.f32 %v1366_v50, %v2575_v54  ;;  %v1460_v33 = vmul.f32 %v1456_v2, %v2575_v54  ;;  %v1430_v5 = vmul.f32 %v1426_v60, %v2575_v54  ;;  %v1261_v16 = vpop.permute.xlu1 %1260 }
 0x346   : > { %1404 = vrot.lane.b32.xlu0 %v1398_v47, %s2256_s25  ;;  %1316 = vrot.lane.b32.xlu1 %v1309_v48, %s2252_s27  ;;  %v1265_v37 = vmul.f32 %v1261_v16, %v2575_v54 }
 0x34a   : > { %1376 = vrot.lane.b32.xlu1 %v1369_v51, %s2254_s26  ;;  %1286 = vrot.lane.b32.xlu0 %v1279_v52, %s2253_s29 }
 0x34e   : > { %1436 = vrot.lane.b32.xlu1 %v1429_v55, %s2257_s23  ;;  %1346 = vrot.lane.b32.xlu0 %v1339_v56, %s2255_s17 }
 0x352   : > { %1406 = vrot.lane.b32.xlu0 %v1399_v58, %s2256_s25  ;;  %1288 = vrot.lane.b32.xlu1 %v1280_v59, %s2253_s29 }
 0x356   : > { %1348 = vrot.lane.b32.xlu0 %v1340_v61, %s2255_s17  ;;  %1318 = vrot.lane.b32.xlu1 %v1310_v62, %s2252_s27  ;;  %s2746_s17 = sld [smem:[#allocation14_spill]] (!%p2640_p11) }
 0x35a   : > { %1408 = vrot.lane.b32.xlu0 %v1400_v0, %s2256_s25  ;;  %1378 = vrot.lane.b32.xlu1 %v1370_v1, %s2254_s26 }
 0x35e   : > { %1468 = vrot.lane.b32.xlu0 %v1460_v33, %s2258_s18  ;;  %1438 = vrot.lane.b32.xlu1 %v1430_v5, %s2257_s23  ;;  %v1491_v5 = vsel %vm1487_vm13, 1.0, %v2242_v17  ;;  %v1594_v17 = vld [vmem:[%s2416_s5 + $0x10] sm:$0xff] }
 0x362   : > { %1466 = vrot.lane.b32.xlu0 %v1459_v10, %s2258_s18  ;;  %1434 = vrot.lane.b32.xlu1 %v1428_v11, %s2257_s23  ;;  %v1592_v10 = vld [vmem:[%s2416_s5] sm:$0xff] }
 0x366   : > { %1464 = vrot.lane.b32.xlu1 %v1458_v13, %s2258_s18  ;;  %v1595_v13 = vld [vmem:[%s2416_s5 + $0x18] sm:$0xff] }
 0x3b0   : > { %v1315_v18 = vpop.permute.xlu1 %1314  ;;  %v1285_v19 = vpop.permute.xlu0 %1284 }
 0x3b1   : > { %v1293_v40 = vadd.f32 %v1285_v19, %v1263_v31 }
 0x3b3   : > { %v1323_v47 = vadd.f32 %v1315_v18, %v1293_v40 }
 0x3b4   : > { %v1375_v20 = vpop.permute.xlu1 %1374  ;;  %v1345_v21 = vpop.permute.xlu0 %1344 }
 0x3b5   : > { %v1353_v52 = vadd.f32 %v1345_v21, %v1323_v47 }
 0x3b7   : > { %v1383_v58 = vadd.f32 %v1375_v20, %v1353_v52 }
 0x3b8   : > { %v1405_v24 = vpop.permute.xlu0 %1404  ;;  %v1317_v25 = vpop.permute.xlu1 %1316 }
 0x3b9   : > { %v1413_v63 = vadd.f32 %v1405_v24, %v1383_v58 }
 0x3bc   : > { %v1377_v23 = vpop.permute.xlu1 %1376  ;;  %v1287_v26 = vpop.permute.xlu0 %1286 }
 0x3bd   : > { %v1294_v28 = vadd.f32 %v1287_v26, %v1264_v27 }
 0x3bf   : > { %v1324_v34 = vadd.f32 %v1317_v25, %v1294_v28 }
 0x3c0   : > { %v1437_v29 = vpop.permute.xlu1 %1436  ;;  %v1347_v30 = vpop.permute.xlu0 %1346 }
 0x3c1   : > { %v1354_v41 = vadd.f32 %v1347_v30, %v1324_v34 }
 0x3c3   : > { %v1384_v49 = vadd.f32 %v1377_v23, %v1354_v41 }
 0x3c4   : > { %v1407_v35 = vpop.permute.xlu0 %1406  ;;  %v1289_v36 = vpop.permute.xlu1 %1288 }
 0x3c5   : > { %v1295_v42 = vadd.f32 %v1289_v36, %v1265_v37  ;;  %v1414_v55 = vadd.f32 %v1407_v35, %v1384_v49 }
 0x3c7   : > { %v1444_v60 = vadd.f32 %v1437_v29, %v1414_v55 }
 0x3c8   : > { %v1349_v44 = vpop.permute.xlu0 %1348  ;;  %v1319_v46 = vpop.permute.xlu1 %1318 }
 0x3c9   : > { %v1325_v48 = vadd.f32 %v1319_v46, %v1295_v42 }
 0x3cb   : > { %v1355_v50 = vadd.f32 %v1349_v44, %v1325_v48 }
 0x3cc   : > { %v1409_v39 = vpop.permute.xlu0 %1408  ;;  %v1379_v51 = vpop.permute.xlu1 %1378 }
 0x3cd   : > { %v1385_v53 = vadd.f32 %v1379_v51, %v1355_v50 }
 0x3cf   : > { %v1415_v22 = vadd.f32 %v1409_v39, %v1385_v53 }
 0x3d0   : > { %v1469_v56 = vpop.permute.xlu0 %1468  ;;  %v1439_v57 = vpop.permute.xlu1 %1438 }
 0x3d1   : > { %v1445_v59 = vadd.f32 %v1439_v57, %v1415_v22 }
 0x3d3   : > { %v1475_v54 = vadd.f32 %v1469_v56, %v1445_v59 }
 0x3d4   : > { %v1467_v61 = vpop.permute.xlu0 %1466  ;;  %v1435_v62 = vpop.permute.xlu1 %1434 }
 0x3d5   : > { %v1474_v0 = vadd.f32 %v1467_v61, %v1444_v60  ;;  %2091 = vmatprep.subr.mxu0 %v1475_v54  ;;  %v1443_v1 = vadd.f32 %v1435_v62, %v1413_v63 }
 0x3d6   : > { %2092 = vmatpush3.msra.mxu0 %v1475_v54 }
 0x3d7   : > { %2093 = vmatprep.subr.mxu0 %v1474_v0 }
 0x3d8   : > { %v1465_v2 = vpop.permute.xlu1 %1464  ;;  %2094 = vmatpush3.msra.mxu0 %v1474_v0 }
 0x3d9   : > { %v1473_v33 = vadd.f32 %v1465_v2, %v1443_v1 }
 0x3db   : > { %2095 = vmatprep.subr.mxu0 %v1473_v33 }
 0x3dc   : > { %2096 = vmatpush3.msra.mxu0 %v1473_v33 }
 0x3dd   : > { %2098 = vmatmul.mubr.msk.f32.vlgmr.msra.gmra.mxu0 %vm1494_vm12, %v1491_v5 }
 0x3de   : > { %2100 = vmatprep.mubr.msk.f32.mxu0 %vm1494_vm12, %v1492_v6 }
 0x3e1   : > { %2101 = vmatmul.mubr.msk.f32.gmra.mxu0 %vm1494_vm12, %v1493_v9 }
 0x49d   : > { %v2099_v7 = vpop.f32.mrf.mxu0 }
 0x49e   : > { %v1597_v11 = vmul.f32 %v2099_v7, %v1593_v4 }
 0x49f   : > { %v1573_v12 = vpop.f32.mrf.mxu0 }
 0x4a0   : > { %v1601_v14 = vadd.f32 %v1597_v11, %v2511_v43  ;;  %v1596_v15 = vmul.f32 %v1592_v10, %v1573_v12 }
 0x4a1   : > { %v2102_v3 = vpop.f32.mrf.mxu0 }
 0x4a2   : > { %v1605_v8 = vmax.f32 %v1601_v14, 0.0  ;;  %v1600_v16 = vadd.f32 %v1596_v15, %v2516_v45  ;;  %v1599_v18 = vmul.f32 %v2102_v3, %v1595_v13 }
 0x4a3   : > { %v1583_v19 = vpop.f32.mrf.mxu0 }
 0x4a4   : > { %1610 = vst.msk [vmem:[#allocation2 + $0x8] sm:$0xff] %vm1608_vm0, %v1605_v8  ;;  %v1604_v20 = vmax.f32 %v1600_v16, 0.0  ;;  %v1603_v21 = vadd.f32 %v1599_v18, %v2501_v32  ;;  %v1598_v24 = vmul.f32 %v1594_v17, %v1583_v19 }
 0x4a6   : > { %1609 = vst.msk [vmem:[#allocation2] sm:$0xff] %vm1608_vm0, %v1604_v20  ;;  %v1607_v25 = vmax.f32 %v1603_v21, 0.0  ;;  %v1602_v43 = vadd.f32 %v1598_v24, %v2504_v38  ;;  %1618 = sbr.rel (%p2640_p11) target bundleno = 1596 (0x63c), region = 96 }
 0x4a8   : > { %1612 = vst.msk [vmem:[#allocation2 + $0x18] sm:$0xff] %vm1608_vm0, %v1607_v25  ;;  %v1606_v23 = vmax.f32 %v1602_v43, 0.0 }
 0x4aa   : > { %1611 = vst.msk [vmem:[#allocation2 + $0x10] sm:$0xff] %vm1608_vm0, %v1606_v23 }
 0x4ab   : > { %v1619_v45 = vld [vmem:[%s2744_s21] sm:$0xff]  ;;  %2105 = vmatprep.mubr.msk.f32.mxu0 %vm1608_vm0, %v1604_v20  ;;  %v1711_v32 = vld [vmem:[%s2745_s4 + $0x8] sm:$0xff]  ;;  %vm1800_vm1 = vcmask 7168  }
 0x4ac   : > { %2103 = vmatprep.subr.mxu0 %v1619_v45  ;;  %v1710_v38 = vld [vmem:[%s2745_s4] sm:$0xff]  ;;  %2108 = vmatprep.subr.mxu1 %v1711_v32 }
 0x4ad   : > { %2104 = vmatpush3.msra.mxu0 %v1619_v45  ;;  %2109 = vmatpush3.msra.mxu1 %v1711_v32  ;;  %v1978_v26 = vld [vmem:[%s2746_s17] ss:$0 sm:$0xff] }
 0x4ae   : > { %2106 = vmatmul.mubr.msk.f32.vlgmr.msra.gmra.mxu0 %vm1608_vm0, %v1605_v8  ;;  %2110 = vmatprep.subr.mxu1 %v1710_v38  ;;  %v1981_v35 = vld [vmem:[#allocation3] ss:$0 sm:$0xff] }
 0x4af   : > { %2111 = vmatpush3.msra.mxu1 %v1710_v38 }
 0x56e   : > { %v2107_v27 = vpop.f32.mrf.mxu0 }
 0x56f   : > { %v1705_v28 = vadd.f32 %v2107_v27, %v1978_v26 }
 0x570   : > { %v1699_v29 = vpop.f32.mrf.mxu0 }
 0x571   : > { %v1700_v30 = vadd.f32 %v1978_v26, %v1699_v29  ;;  %v1709_v34 = vmax.f32 %v1705_v28, 0.0 }
 0x573   : > { %v1708_v31 = vmax.f32 %v1700_v30, 0.0 }
 0x575   : > { %2112 = vmatprep.mubr.msk.f32.mxu1 %vm943_vm6, %v1708_v31 }
 0x576   : > { %2113 = vmatmul.mubr.msk.f32.vlgmr.msra.gmra.mxu1 %vm943_vm6, %v1709_v34 }
 0x636   : > { %v2114_v36 = vpop.f32.mrf.mxu1 }
 0x637   : > { %v1797_v37 = vadd.f32 %v2114_v36, %v1981_v35 }
 0x638   : > { %v1791_v40 = vpop.f32.mrf.mxu1 }
 0x639   : > { %1802 = vst.msk [vmem:[%s2747_s24 + $0x8] sm:$0xff] %vm1800_vm1, %v1797_v37  ;;  %v1792_v41 = vadd.f32 %v1981_v35, %v1791_v40 }
 0x63b   : > { %1801 = vst.msk [vmem:[%s2747_s24] sm:$0xff] %vm1800_vm1, %v1792_v41 }
 0x63c PF: > { %s2748_s18 = sld [smem:[#allocation8_spill]] }
 0x63d   : > { %s2749_s26 = sld [smem:[#allocation6_spill]] }
 0x63e   : > { %s2750_s27 = sld [smem:[#allocation7_spill]] }
 0x63f   : > { %s2751_s28 = sld [smem:[#allocation9_spill]] }
 0x640   : > { %s2752_s29 = sld [smem:[#allocation10_spill]] }
 0x642   : > { %s29_s0 = sadd.s32 1, %s2748_s18  }
 0x643   : > { %p26_p12 = scmp.ge.s32.totalorder %s29_s0, 16  }
 0x645   :  { %28 = sbr.rel (!%p26_p12) target bundleno = 8 (0x8), region = 149 }

</bundles_post_ra>
